<compile_context>
chip_gen: v5e
topology: v5e:2x2
jax: 0.10.0
libtpu: 0.0.40
codegen_flags: <defaults>
</compile_context>

<pallas_src>
import math
from typing import NamedTuple

import jax
import jax.numpy as jnp
from jax.experimental import pallas as pl
from jax.experimental.pallas import tpu as pltpu

LANES = 128
SUBLANES = 8


def _round_up(v, m):
    return -(-v // m) * m


class PreparedX(NamedTuple):
    x2: jax.Array          # (n_splits*steps*tn_rows, 128) f32, lane-dense
    n_valid: int           # original N
    pad_value: jax.Array   # scalar f32 value used for the padded tail
    tn_rows: int
    n_splits: int
    steps: int


def _num_tensorcores():
    """Best-effort TensorCores-per-device (v7x / megacore chips report 2)."""
    try:
        info = pltpu.get_tpu_info()
        for attr in ("num_cores", "core_count", "num_tensorcores",
                     "tensorcores_per_chip"):
            v = getattr(info, attr, None)
            if v:
                return int(v)
    except Exception:
        pass
    try:
        v = getattr(jax.devices()[0], "num_cores", None)
        if v:
            return int(v)
    except Exception:
        pass
    return 1


def prepare_x(x, *, tn_rows=8192, n_splits=None):
    """Lane-dense relayout of x: pad + reshape to (rows, 128).

    In the PNL training loop x is fixed while Pi/Mu/Var are optimized: call
    this ONCE outside the loop and pass the PreparedX to mix_gaussian_layer
    to avoid an extra HBM read+write of x on every step.
    """
    xf = jnp.asarray(x, jnp.float32).reshape(-1)
    n_valid = int(xf.shape[0])
    rows_needed = max(1, -(-n_valid // LANES))

    if n_splits is None:
        # Split N across TensorCores whenever each core gets a few (8,128)
        # tiles of work; single-TC chips (v5e/v6e) stay at 1.
        n_splits = 2 if (_num_tensorcores() >= 2 and rows_needed >= 2 * 64) else 1
    n_splits = max(1, int(n_splits))

    per_split_rows = -(-rows_needed // n_splits)
    tn = max(SUBLANES, min(int(tn_rows), _round_up(per_split_rows, SUBLANES)))
    tn = _round_up(tn, SUBLANES)
    steps = max(1, -(-per_split_rows // tn))

    total_rows = n_splits * steps * tn
    total = total_rows * LANES

    # Pad with an in-support value (mean of the data) so log(mix(pad)) stays
    # finite; the padded contribution is subtracted exactly in the wrapper.
    pad_value = jnp.mean(xf)
    if total > n_valid:
        xf = jnp.concatenate(
            [xf, jnp.full((total - n_valid,), pad_value, jnp.float32)])
    x2 = xf.reshape(total_rows, LANES)
    return PreparedX(x2, n_valid, pad_value, tn, n_splits, steps)


def _mix_gaussian_kernel(mu_ref, neginv_ref, logcoef_ref, x_ref, out_ref, acc_ref):
    i = pl.program_id(1)          # reduction steps over N (per split)

    @pl.when(i == 0)
    def _():
        acc_ref[...] = jnp.zeros_like(acc_ref)

    x = x_ref[...].astype(jnp.float32)   # (tn_rows, 128) lane-dense samples
    K = mu_ref.shape[0]                  # static mixture size

    # log-density: log(sum_k exp(neginv_k * (x - mu_k)^2 + log(coef_k))).
    # K (=3) unrolled; parameters are SMEM scalars broadcast against the tile.
    mix = None
    for k in range(K):
        d = x - mu_ref[k]
        t = d * d * neginv_ref[k] + logcoef_ref[k]    # FMA-friendly
        e = jnp.exp(t)
        mix = e if mix is None else mix + e
    log_m = jnp.log(mix)                 # (tn_rows, 128)

    # Pure-VPU partial sum into the (8, 128) accumulator; no per-step XLU.
    rows = log_m.shape[0]
    partial = log_m.reshape(rows // SUBLANES, SUBLANES, LANES).sum(axis=0)
    acc_ref[...] += partial

    @pl.when(i == pl.num_programs(1) - 1)
    def _():
        # One cross-lane reduce per split (XLU slot is otherwise idle here).
        out_ref[...] = jnp.sum(acc_ref[...]).reshape(1, 1, 1)


def mix_gaussian_layer(x, Pi, Mu, Var, *, tn_rows=8192, n_splits=None):
    """x: (N,1) f32 or a PreparedX; Pi/Mu/Var: (K,1) f32. Returns (1,) f32."""
    prep = x if isinstance(x, PreparedX) else prepare_x(
        x, tn_rows=tn_rows, n_splits=n_splits)
    x2, n_valid, pad_value, tn, n_splits, steps = prep
    total = int(x2.shape[0]) * LANES

    K = int(Pi.shape[0])
    # ---- Hoisted O(K) parameter math (tiny XLA ops, outside the grid loop) ----
    pi = Pi.reshape(K).astype(jnp.float32)
    mu = Mu.reshape(K).astype(jnp.float32)
    var = Var.reshape(K).astype(jnp.float32)
    cpi = jax.nn.softmax(pi)                                # softmax(Pi, 0)
    coef = cpi / jnp.sqrt(2.0 * math.pi * var * var)        # Pi / sqrt(2*pi*Var^2)
    neginv = -0.5 / (var * var)                             # -1 / (2*Var^2)
    logcoef = jnp.log(coef)                                 # folded into exponent

    smem_spec = pl.BlockSpec(memory_space=pltpu.MemorySpace.SMEM)

    out = pl.pallas_call(
        _mix_gaussian_kernel,
        out_shape=jax.ShapeDtypeStruct((n_splits, 1, 1), jnp.float32),
        grid_spec=pltpu.PrefetchScalarGridSpec(
            num_scalar_prefetch=0,
            grid=(n_splits, steps),
            in_specs=[
                smem_spec,                                   # Mu      (K,) SMEM
                smem_spec,                                   # neginv  (K,) SMEM
                smem_spec,                                   # logcoef (K,) SMEM
                pl.BlockSpec((tn, LANES),
                             lambda s, i: (s * steps + i, 0)),  # x tile
            ],
            out_specs=pl.BlockSpec((1, 1, 1), lambda s, i: (s, 0, 0)),
            scratch_shapes=[pltpu.VMEM((SUBLANES, LANES), jnp.float32)],
        ),
        compiler_params=pltpu.CompilerParams(
            dimension_semantics=("parallel", "arbitrary"),
            vmem_limit_bytes=32 * 1024 * 1024),
    )(mu, neginv, logcoef, x2)

    result = out.reshape(()) if n_splits == 1 else jnp.sum(out)

    # Exact correction for the padded tail samples: each padded element
    # contributed log(mix(pad_value)) to the in-kernel sum.
    pad_count = total - n_valid
    if pad_count:
        pad_logp = jnp.log(jnp.sum(jnp.exp(neginv * (pad_value - mu) ** 2 + logcoef)))
        result = result - pad_count * pad_logp
    return result.reshape(1)


def reference(x, Pi, Mu, Var):
    """Pure-JAX transcription of the PyTorch forward, for validation."""
    cpi = jax.nn.softmax(Pi, axis=0)                                  # (K,1)
    m1 = -((x - Mu.T) ** 2) / (2.0 * (Var.T ** 2))                    # (N,K)
    m2 = jnp.exp(m1) @ (cpi / jnp.sqrt(2.0 * math.pi * Var ** 2))     # (N,1)
    return jnp.sum(jnp.log(m2)).reshape(1)


if __name__ == "__main__":
    Mix_K = 3
    N = 300   # deliberately NOT a multiple of 128 to exercise the tail correction

    key = jax.random.PRNGKey(0)
    kx, kpi, kmu, kvar = jax.random.split(key, 4)

    # Deterministic synthetic inputs (param shapes from __init__: randn(K, 1)).
    x = jax.random.normal(kx, (N, 1), dtype=jnp.float32)
    Pi = jax.random.normal(kpi, (Mix_K, 1), dtype=jnp.float32)
    Mu = jax.random.normal(kmu, (Mix_K, 1), dtype=jnp.float32)
    Var = jax.random.normal(kvar, (Mix_K, 1), dtype=jnp.float32)

    out = jax.block_until_ready(mix_gaussian_layer(x, Pi, Mu, Var))
    ref = jax.block_until_ready(reference(x, Pi, Mu, Var))

    assert out.shape == (1,)
    assert jnp.allclose(out, ref, rtol=1e-4, atol=1e-3), (out, ref)

    # Cached-relayout path (x is fixed across PNL optimizer steps).
    prep = prepare_x(x)
    out2 = jax.block_until_ready(mix_gaussian_layer(prep, Pi, Mu, Var))
    assert jnp.allclose(out2, ref, rtol=1e-4, atol=1e-3), (out2, ref)

    print("KERNEL_OK")
</pallas_src>

<mosaic_0001>
module attributes {stable_mosaic.version = 11 : i64} {
  func.func @_mix_gaussian_kernel(%arg0: i32, %arg1: i32, %arg2: memref<3xf32, #tpu.memory_space<smem>>, %arg3: memref<3xf32, #tpu.memory_space<smem>>, %arg4: memref<3xf32, #tpu.memory_space<smem>>, %arg5: memref<8x128xf32, #tpu.memory_space<vmem>>, %arg6: memref<1x1x1xf32, #tpu.memory_space<vmem>>, %arg7: memref<8x128xf32, #tpu.memory_space<vmem>>) attributes {dimension_semantics = [#tpu.dimension_semantics<parallel>, #tpu.dimension_semantics<arbitrary>], iteration_bounds = array<i64: 1, 1>, scalar_prefetch = 0 : i64, scratch_operands = 1 : i64, tpu.core_type = #tpu.core_type<tc>, window_params = [{transform_indices = @transform_0, window_bounds = array<i64: 3>}, {transform_indices = @transform_1, window_bounds = array<i64: 3>}, {transform_indices = @transform_2, window_bounds = array<i64: 3>}, {transform_indices = @transform_3, window_bounds = array<i64: 8, 128>}, {transform_indices = @transform_4, window_bounds = array<i64: 1, 1, 1>}]} {
    %c0_i32 = arith.constant 0 : i32
    %0 = arith.cmpi eq, %arg1, %c0_i32 : i32
    %1 = arith.extui %0 : i1 to i32
    %c0_i32_0 = arith.constant 0 : i32
    %2 = arith.cmpi ne, %1, %c0_i32_0 : i32
    scf.if %2 {
      %cst_15 = arith.constant 0.000000e+00 : f32
      %48 = vector.broadcast %cst_15 : f32 to vector<8x128xf32>
      %c0_16 = arith.constant 0 : index
      %c0_17 = arith.constant 0 : index
      %49 = vector.load %arg7[%c0_16, %c0_17] : memref<8x128xf32, #tpu.memory_space<vmem>>, vector<8x128xf32>
      tpu.vector_store %arg7[%c0_16, %c0_17], %48 {strides = array<i32>} : memref<8x128xf32, #tpu.memory_space<vmem>>, vector<8x128xf32>,
    } else {
    }
    %c0 = arith.constant 0 : index
    %c0_1 = arith.constant 0 : index
    %3 = vector.load %arg5[%c0, %c0_1] : memref<8x128xf32, #tpu.memory_space<vmem>>, vector<8x128xf32>
    %c0_2 = arith.constant 0 : index
    %4 = memref.load %arg2[%c0_2] : memref<3xf32, #tpu.memory_space<smem>>
    %5 = vector.broadcast %4 : f32 to vector<8x128xf32>
    %6 = arith.subf %3, %5 : vector<8x128xf32>
    %7 = arith.mulf %6, %6 : vector<8x128xf32>
    %c0_3 = arith.constant 0 : index
    %8 = memref.load %arg3[%c0_3] : memref<3xf32, #tpu.memory_space<smem>>
    %9 = vector.broadcast %8 : f32 to vector<8x128xf32>
    %10 = arith.mulf %7, %9 : vector<8x128xf32>
    %c0_4 = arith.constant 0 : index
    %11 = memref.load %arg4[%c0_4] : memref<3xf32, #tpu.memory_space<smem>>
    %12 = vector.broadcast %11 : f32 to vector<8x128xf32>
    %13 = arith.addf %10, %12 : vector<8x128xf32>
    %14 = math.exp %13 : vector<8x128xf32>
    %c1 = arith.constant 1 : index
    %15 = memref.load %arg2[%c1] : memref<3xf32, #tpu.memory_space<smem>>
    %16 = vector.broadcast %15 : f32 to vector<8x128xf32>
    %17 = arith.subf %3, %16 : vector<8x128xf32>
    %18 = arith.mulf %17, %17 : vector<8x128xf32>
    %c1_5 = arith.constant 1 : index
    %19 = memref.load %arg3[%c1_5] : memref<3xf32, #tpu.memory_space<smem>>
    %20 = vector.broadcast %19 : f32 to vector<8x128xf32>
    %21 = arith.mulf %18, %20 : vector<8x128xf32>
    %c1_6 = arith.constant 1 : index
    %22 = memref.load %arg4[%c1_6] : memref<3xf32, #tpu.memory_space<smem>>
    %23 = vector.broadcast %22 : f32 to vector<8x128xf32>
    %24 = arith.addf %21, %23 : vector<8x128xf32>
    %25 = math.exp %24 : vector<8x128xf32>
    %26 = arith.addf %14, %25 : vector<8x128xf32>
    %c2 = arith.constant 2 : index
    %27 = memref.load %arg2[%c2] : memref<3xf32, #tpu.memory_space<smem>>
    %28 = vector.broadcast %27 : f32 to vector<8x128xf32>
    %29 = arith.subf %3, %28 : vector<8x128xf32>
    %30 = arith.mulf %29, %29 : vector<8x128xf32>
    %c2_7 = arith.constant 2 : index
    %31 = memref.load %arg3[%c2_7] : memref<3xf32, #tpu.memory_space<smem>>
    %32 = vector.broadcast %31 : f32 to vector<8x128xf32>
    %33 = arith.mulf %30, %32 : vector<8x128xf32>
    %c2_8 = arith.constant 2 : index
    %34 = memref.load %arg4[%c2_8] : memref<3xf32, #tpu.memory_space<smem>>
    %35 = vector.broadcast %34 : f32 to vector<8x128xf32>
    %36 = arith.addf %33, %35 : vector<8x128xf32>
    %37 = math.exp %36 : vector<8x128xf32>
    %38 = arith.addf %26, %37 : vector<8x128xf32>
    %39 = math.log %38 : vector<8x128xf32>
    %40 = vector.shape_cast %39 : vector<8x128xf32> to vector<1x8x128xf32>
    %cst = arith.constant dense<0.000000e+00> : vector<8x128xf32>
    %41 = vector.multi_reduction <add>, %40, %cst [0] : vector<1x8x128xf32> to vector<8x128xf32>
    %c0_9 = arith.constant 0 : index
    %c0_10 = arith.constant 0 : index
    %42 = vector.load %arg7[%c0_9, %c0_10] : memref<8x128xf32, #tpu.memory_space<vmem>>, vector<8x128xf32>
    %43 = arith.addf %42, %41 : vector<8x128xf32>
    %c0_11 = arith.constant 0 : index
    %c0_12 = arith.constant 0 : index
    %44 = vector.load %arg7[%c0_11, %c0_12] : memref<8x128xf32, #tpu.memory_space<vmem>>, vector<8x128xf32>
    tpu.vector_store %arg7[%c0_11, %c0_12], %43 {strides = array<i32>} : memref<8x128xf32, #tpu.memory_space<vmem>>, vector<8x128xf32>,
    %c0_i32_13 = arith.constant 0 : i32
    %45 = arith.cmpi eq, %arg1, %c0_i32_13 : i32
    %46 = arith.extui %45 : i1 to i32
    %c0_i32_14 = arith.constant 0 : i32
    %47 = arith.cmpi ne, %46, %c0_i32_14 : i32
    scf.if %47 {
      %c0_15 = arith.constant 0 : index
      %c0_16 = arith.constant 0 : index
      %48 = vector.load %arg7[%c0_15, %c0_16] : memref<8x128xf32, #tpu.memory_space<vmem>>, vector<8x128xf32>
      %49 = vector.shape_cast %48 : vector<8x128xf32> to vector<1x8x128xf32>
      %cst_17 = arith.constant dense<0.000000e+00> : vector<1xf32>
      %50 = vector.multi_reduction <add>, %49, %cst_17 [1, 2] : vector<1x8x128xf32> to vector<1xf32>
      %51 = vector.shape_cast %50 : vector<1xf32> to vector<1x1x1xf32>
      %52 = vector.extract %51[0, 0, 0] : f32 from vector<1x1x1xf32>
      %53 = vector.broadcast %52 : f32 to vector<1x1x1xf32>
      %c0_18 = arith.constant 0 : index
      %c0_19 = arith.constant 0 : index
      %c0_20 = arith.constant 0 : index
      %54 = vector.load %arg6[%c0_18, %c0_19, %c0_20] : memref<1x1x1xf32, #tpu.memory_space<vmem>>, vector<1x1x1xf32>
      tpu.vector_store %arg6[%c0_18, %c0_19, %c0_20], %53 {strides = array<i32>} : memref<1x1x1xf32, #tpu.memory_space<vmem>>, vector<1x1x1xf32>,
    } else {
    }
    return
  }
  func.func @transform_0(%arg0: i32, %arg1: i32) -> i32 {
    %c0_i32 = arith.constant 0 : i32
    %c0_i32_0 = arith.constant 0 : i32
    return %c0_i32 : i32
  }
  func.func @transform_1(%arg0: i32, %arg1: i32) -> i32 {
    %c0_i32 = arith.constant 0 : i32
    %c0_i32_0 = arith.constant 0 : i32
    return %c0_i32 : i32
  }
  func.func @transform_2(%arg0: i32, %arg1: i32) -> i32 {
    %c0_i32 = arith.constant 0 : i32
    %c0_i32_0 = arith.constant 0 : i32
    return %c0_i32 : i32
  }
  func.func @transform_3(%arg0: i32, %arg1: i32) -> (i32, i32) {
    %c1_i32 = arith.constant 1 : i32
    %0 = arith.muli %arg0, %c1_i32 : i32
    %1 = arith.addi %0, %arg1 : i32
    %c0_i32 = arith.constant 0 : i32
    %c0_i32_0 = arith.constant 0 : i32
    return %1, %c0_i32 : i32, i32
  }
  func.func @transform_4(%arg0: i32, %arg1: i32) -> (i32, i32, i32) {
    %c0_i32 = arith.constant 0 : i32
    %c0_i32_0 = arith.constant 0 : i32
    %c0_i32_1 = arith.constant 0 : i32
    return %arg0, %c0_i32, %c0_i32_0 : i32, i32, i32
  }
}

</mosaic_0001>

<bundles_post_ra>
// kernel: tpu_custom_call.1
= control target key start
LH: loop header
LB: loop body
LE: loop exit
PB: predicated region body
PF: predicated region fallthrough
CT: control target
= control target key end

     0   :  { %9 = vsyncpa [#allocation6], 0  ;;  %s319_s0 = inlined_call_operand.hbm [shape: f32[3], index: 0, kind: input, shape index: {}]   ;;  %s320_s1 = inlined_call_operand.hbm [shape: f32[3], index: 1, kind: input, shape index: {}]   ;;  %s321_s2 = inlined_call_operand.vmem [shape: f32[3], index: 2, kind: input, shape index: {}]   ;;  %s322_s3 = inlined_call_operand.hbm [shape: f32[8,128], index: 3, kind: input, shape index: {}]   ;;  %s323_s4 = inlined_call_operand.hbm [shape: f32[1,1,1], index: 4, kind: output, shape index: {}]  }
   0x1   :  { %10 = vsyncpa [#allocation9], 0 }
   0x2   :  { %11 = vsyncpa [#allocation7], 0 }
   0x3   :  { %12 = vsyncpa [#allocation4], 0 }
   0x4   :  { %13 = vsyncpa [#allocation5], 0  ;;  %s19_s17 = sshll.u32 %s319_s0, 4  ;;  %s28_s20 = sshll.u32 %s320_s1, 4  ;;  %s20_s17 = int_to_ptr.hbm [resolvable:$true] %s19_s17  ;;  %s29_s20 = int_to_ptr.hbm [resolvable:$true] %s28_s20 }
   0x5   :  { %s274_s21 = smov [#allocation3]   ;;  %s275_s22 = smov [#allocation8]  }
   0x6   :  { %22 = dma.hbm_to_smem %s20_s17, 16, %s274_s21, [#allocation6]  }
   0x7   :  { %31 = dma.hbm_to_smem %s29_s20, 16, %s275_s22, [#allocation9]  }
   0x8   :  { %s37_s25 = sshll.u32 %s321_s2, 4  ;;  %s49_s28 = sshll.u32 %s322_s3, 4  ;;  %s38_s25 = int_to_ptr.vmem [resolvable:$true] %s37_s25  ;;  %s50_s28 = int_to_ptr.hbm [resolvable:$true] %s49_s28 }
   0x9   :  { %s276_s0 = smov [#allocation10]   ;;  %s277_s29 = smov [#allocation11]  }
   0xa   :  { %40 = dma.vmem_to_smem %s38_s25, 16, %s276_s0, [#allocation7]  }
   0xb   :  { %s51_s30 = sshll.u32 %s277_s29, 4  ;;  %s52_s30 = int_to_ptr.vmem [resolvable:$true] %s51_s30 }
   0xc   :  { %54 = dma.hbm_to_vmem [thread:$0]  %s50_s28, 128, %s52_s30, [#allocation4]  }
   0xd   :  { %264 = dma.done.wait [#allocation6], 16  }
   0xe   :  { %265 = vsyncadd [#allocation6], 4294967280 }
   0xf   :  { %266 = dma.done.wait [#allocation9], 16  }
  0x10   :  { %267 = vsyncadd [#allocation9], 4294967280 }
  0x11   :  { %268 = dma.done.wait [#allocation7], 16  }
  0x12   :  { %269 = vsyncadd [#allocation7], 4294967280 }
  0x13   :  { %270 = dma.done.wait [#allocation4], 128  }
  0x14   :  { %271 = vsyncadd [#allocation4], 4294967168 }
  0x15   :  { %71 = sfence }
  0x16   :  { %s79_s1 = sld [smem:[#allocation3]]  ;;  %v78_v0 = vld [vmem:[#allocation11] sm:$0xff]  ;;  %s278_s11 = smov [#allocation12]   ;;  %vm137_vm0 = vcmask 0  }
  0x17   :  { %s83_s2 = sld [smem:[#allocation8]]  ;;  %s144_s12 = sshll.u32 %s278_s11, 4  ;;  %s145_s12 = int_to_ptr.vmem [resolvable:$true] %s144_s12 }
  0x18   :  { %s86_s5 = sld [smem:[#allocation10]]  ;;  %s146_s15 = sshll.u32 %s323_s4, 4  ;;  %s147_s15 = int_to_ptr.hbm [resolvable:$true] %s146_s15 }
  0x19   :  { %s159_s3 = sld [smem:[#allocation3 + $0x1]] }
  0x1a   :  { %s160_s6 = sld [smem:[#allocation8 + $0x1]] }
  0x1b   :  { %s161_s7 = sld [smem:[#allocation10 + $0x1]] }
  0x1c   :  { %v80_v1 = vstv %s79_s1  ;;  %s162_s8 = sld [smem:[#allocation3 + $0x2]] }
  0x1d   :  { %v81_v2 = vsub.f32 %v78_v0, %v80_v1  ;;  %s163_s9 = sld [smem:[#allocation8 + $0x2]]  ;;  %v84_v3 = vstv %s83_s2 }
  0x1e   :  { %s164_s10 = sld [smem:[#allocation10 + $0x2]]  ;;  %v87_v6 = vstv %s86_s5 }
  0x1f   :  { %v82_v4 = vmul.f32 %v81_v2, %v81_v2  ;;  %v92_v5 = vstv %s159_s3 }
  0x20   :  { %v93_v7 = vsub.f32 %v78_v0, %v92_v5  ;;  %v96_v9 = vstv %s160_s6 }
  0x21   :  { %v85_v8 = vmul.f32 %v84_v3, %v82_v4  ;;  %v99_v13 = vstv %s161_s7 }
  0x22   :  { %v94_v10 = vmul.f32 %v93_v7, %v93_v7  ;;  %v105_v11 = vstv %s162_s8 }
  0x23   :  { %v88_v12 = vadd.f32 %v87_v6, %v85_v8  ;;  %v106_v14 = vsub.f32 %v78_v0, %v105_v11  ;;  %v109_v16 = vstv %s163_s9 }
  0x24   :  { %v97_v15 = vmul.f32 %v96_v9, %v94_v10  ;;  %v112_v20 = vstv %s164_s10 }
  0x25   :  { %v89_v17 = vmul.f32 1.442695, %v88_v12  ;;  %v107_v18 = vmul.f32 %v106_v14, %v106_v14 }
  0x26   :  { %v100_v19 = vadd.f32 %v99_v13, %v97_v15 }
  0x27   :  { %v110_v21 = vmul.f32 %v109_v16, %v107_v18  ;;  %172 = vpow2.f32 %v89_v17 }
  0x28   :  { %v101_v22 = vmul.f32 1.442695, %v100_v19 }
  0x29   :  { %v113_v23 = vadd.f32 %v112_v20, %v110_v21 }
  0x2a   :  { %174 = vpow2.f32 %v101_v22 }
  0x2b   :  { %v114_v24 = vmul.f32 1.442695, %v113_v23 }
  0x2d   :  { %176 = vpow2.f32 %v114_v24  ;;  %v173_v25 = vpop.eup %172 }
  0x30   :  { %v175_v26 = vpop.eup %174 }
  0x31   :  { %v103_v27 = vadd.f32 %v175_v26, %v173_v25 }
  0x33   :  { %v177_v28 = vpop.eup %176 }
  0x34   :  { %v116_v29 = vadd.f32 %v177_v28, %v103_v27 }
  0x36   :  { %178 = vlog2.f32 %v116_v29 }
  0x3c   :  { %v179_v30 = vpop.eup %178 }
  0x3d   :  { %v118_v31 = vmul.f32 0.6931472, %v179_v30 }
  0x3f   :  { %127 = vadd.xlane.f32.xlu0 %v118_v31 }
  0xb2   :  { %v128_v32 = vpop.xlane.xlu0 %127 }
  0xb3   :  { %v129_v33 = vrot.slane %v128_v32, 4 }
  0xb5   :  { %v130_v34 = vadd.f32 %v129_v33, %v128_v32 }
  0xb7   :  { %v131_v35 = vrot.slane %v130_v34, 2 }
  0xb9   :  { %v132_v36 = vadd.f32 %v131_v35, %v130_v34 }
  0xbb   :  { %v133_v37 = vrot.slane %v132_v36, 1 }
  0xbd   :  { %v134_v38 = vadd.f32 %v133_v37, %v132_v36 }
  0xbf   :  { %165 = vpush %v134_v38 }
  0xf0   :  { %s166_s16 = spop %165 }
  0xf1   :  { %v136_v39 = vstv %s166_s16 }
  0xf2   :  { %138 = vst.msk [vmem:[#allocation12] sm:$0x1] %vm137_vm0, %v136_v39 }
  0xf3   :  { %149 = dma.vmem_to_hbm [thread:$0]  %s145_s12, 16, %s147_s15, [#allocation5]  }
  0xf4   :  { %272 = dma.done.wait [#allocation5], 16  }
  0xf5   :  { %273 = vsyncadd [#allocation5], 4294967280 }
  0xf6   :  { %154 = vsyncpa [#allocation4], 1 }
  0xf7   :  { %155 = vsyncpa [#allocation5], 1 }
  0xf8   :  { %156 = vsyncpa [#allocation6], 1 }
  0xf9   :  { %157 = vsyncpa [#allocation9], 1 }
  0xfa   :  { %158 = vsyncpa [#allocation7], 1 }

</bundles_post_ra>
